<compile_context>
chip_gen: v7x
topology: tpu7x:2x2x1
jax: 0.10.0
libtpu: 0.0.40
codegen_flags: <defaults>
</compile_context>

<pallas_src>
import functools

import numpy as np
import jax
import jax.numpy as jnp
from jax.experimental import pallas as pl
from jax.experimental.pallas import tpu as pltpu


def _bottleneck_kernel(x_ref, s1_ref, b1_ref, w1_ref, b2_ref, wband_ref,
                       out_ref, pad_ref, *, H, W, Ci):
    """Per grid step: one image, fully fused BottleNeck body.

    x_ref    : (1, H, W*Cin)   f32   lane-dense NHWC image (width*chan on lanes)
    s1/b1    : (1, W*Cin)      f32   folded BN1 scale / shift, tiled over W
    w1_ref   : (W*Cin, W*Ci)   bf16  block-diagonal 1x1 weight, BN2 scale folded
    b2_ref   : (1, W*Ci)       f32   folded BN2 shift, tiled over W
    wband_ref: (3, W*Ci, W*Cout) bf16 banded 3x3 weights (one band per ky tap)
    out_ref  : (1, H, W*Cout)  lane-dense output tile
    pad_ref  : (H+2, W*Ci)     f32   scratch: activations with top/bottom halo
    """
    f32, bf16 = jnp.float32, jnp.bfloat16

    # --- BN1 + ReLU (f32 element-wise on the VPU) ---
    x = x_ref[0].astype(f32)                                   # (H, W*Cin)
    y = jnp.maximum(x * s1_ref[...] + b1_ref[...], 0.0)

    # --- 1x1 conv as one MXU matmul (bf16 in / f32 acc); BN2 scale is already
    #     folded into the block-diagonal weight. ---
    hid = jnp.dot(y.astype(bf16), w1_ref[...],
                  preferred_element_type=f32)                  # (H, W*Ci)

    # --- BN2 shift + ReLU ---
    a = jnp.maximum(hid + b2_ref[...], 0.0)                    # (H, W*Ci)

    # --- vertically zero-haloed activations in per-image VMEM scratch.
    #     Width padding is folded into the banded weights, so only the
    #     top/bottom halo rows need zeroing; the interior is fully overwritten
    #     every grid step. ---
    pad_ref[0:1, :] = jnp.zeros((1, W * Ci), f32)
    pad_ref[H + 1:H + 2, :] = jnp.zeros((1, W * Ci), f32)
    pad_ref[1:H + 1, :] = a

    # --- 3x3 conv = 3 banded MXU matmuls (one per vertical tap ky),
    #     K = W*Ci, N = W*Cout: the result is produced directly in the
    #     lane-dense (H, W*Cout) output layout (no reshape, no masked store).
    wcout = out_ref.shape[2]
    acc = jnp.zeros((H, wcout), f32)
    for ky in range(3):
        acc = acc + jnp.dot(pad_ref[ky:ky + H, :].astype(bf16),
                            wband_ref[ky],
                            preferred_element_type=f32)
    out_ref[0] = acc.astype(out_ref.dtype)


def bottleneck_forward(x_nchw, params, eps=1e-5):
    """params = (g1, b1, m1, v1, conv1_w[OIHW], g2, b2, m2, v2, conv2_w[OIHW])."""
    g1, be1, m1, v1, conv1_w, g2, be2, m2, v2, conv2_w = params
    N, Cin, H, W = x_nchw.shape
    Ci = conv1_w.shape[0]            # inner_channel = 4 * growth_rate
    Cout = conv2_w.shape[0]          # growth_rate
    f32, bf16 = jnp.float32, jnp.bfloat16

    # ---- eval-mode BN folding -------------------------------------------------
    s1 = (g1 / jnp.sqrt(v1 + eps)).astype(f32)
    t1 = (be1 - m1 * s1).astype(f32)
    s2 = (g2 / jnp.sqrt(v2 + eps)).astype(f32)
    t2 = (be2 - m2 * s2).astype(f32)

    w1 = conv1_w.reshape(Ci, Cin).T.astype(f32)          # (Cin, Ci)
    w1s = w1 * s2[None, :]                               # fold BN2 scale into w1
    w2 = jnp.transpose(conv2_w, (2, 3, 1, 0)).astype(f32)  # (3, 3, Ci, Cout) HWIO

    # ---- lane-tiled BN vectors (channel params replicated over W) -------------
    s1t = jnp.tile(s1, W).reshape(1, W * Cin)
    b1t = jnp.tile(t1, W).reshape(1, W * Cin)
    b2t = jnp.tile(t2, W).reshape(1, W * Ci)

    # ---- block-diagonal 1x1 weight: (W*Cin, W*Ci), bf16 -----------------------
    w1blk = (jnp.einsum('uv,kc->ukvc', jnp.eye(W, dtype=f32), w1s)
             .reshape(W * Cin, W * Ci).astype(bf16))

    # ---- banded 3x3 weights: (3, W*Ci, W*Cout), bf16 --------------------------
    # wband[ky][w_in*Ci + c, w_out*Cout + o] = w2[ky, w_in - w_out + 1, c, o]
    # (out-of-band entries are zero, which also implements the width padding).
    w_in = jnp.arange(W)[:, None, None]
    kx = jnp.arange(3)[None, :, None]
    w_out = jnp.arange(W)[None, None, :]
    sel = (w_in == w_out + kx - 1).astype(f32)                  # (W, 3, W)
    wband = (jnp.einsum('ixw,yxco->yicwo', sel, w2)
             .reshape(3, W * Ci, W * Cout).astype(bf16))

    # ---- glue: NCHW -> lane-dense (N, H, W*Cin) -------------------------------
    x_rows = jnp.transpose(x_nchw, (0, 2, 3, 1)).reshape(N, H, W * Cin)

    kernel = functools.partial(_bottleneck_kernel, H=H, W=W, Ci=Ci)
    grid_spec = pltpu.PrefetchScalarGridSpec(
        num_scalar_prefetch=0,
        grid=(N,),
        in_specs=[
            pl.BlockSpec((1, H, W * Cin), lambda n: (n, 0, 0)),        # x tile
            pl.BlockSpec((1, W * Cin), lambda n: (0, 0)),              # s1 (resident)
            pl.BlockSpec((1, W * Cin), lambda n: (0, 0)),              # b1 (resident)
            pl.BlockSpec((W * Cin, W * Ci), lambda n: (0, 0)),         # w1blk (resident)
            pl.BlockSpec((1, W * Ci), lambda n: (0, 0)),               # b2 (resident)
            pl.BlockSpec((3, W * Ci, W * Cout), lambda n: (0, 0, 0)),  # wband (resident)
        ],
        out_specs=pl.BlockSpec((1, H, W * Cout), lambda n: (n, 0, 0)),
        scratch_shapes=[pltpu.VMEM((H + 2, W * Ci), jnp.float32)],
    )
    out = pl.pallas_call(
        kernel,
        out_shape=jax.ShapeDtypeStruct((N, H, W * Cout), x_nchw.dtype),
        grid_spec=grid_spec,
        compiler_params=pltpu.CompilerParams(
            dimension_semantics=("parallel",),
            vmem_limit_bytes=32 * 1024 * 1024,
        ),
    )(x_rows, s1t, b1t, w1blk, b2t, wband)

    # ---- glue: lane-dense rows -> NCHW, concat with the input -----------------
    out_nchw = jnp.transpose(out.reshape(N, H, W, Cout), (0, 3, 1, 2))
    return jnp.concatenate([x_nchw, out_nchw], axis=1)


def _reference(x_nchw, params, eps=1e-5):
    """Pure-JAX reference (eval-mode BN, bf16 conv operands / f32 accumulation)."""
    g1, be1, m1, v1, conv1_w, g2, be2, m2, v2, conv2_w = params
    Ci, Cin = conv1_w.shape[0], conv1_w.shape[1]
    Cout = conv2_w.shape[0]
    f32, bf16 = jnp.float32, jnp.bfloat16

    s1 = g1 / jnp.sqrt(v1 + eps)
    t1 = be1 - m1 * s1
    s2 = g2 / jnp.sqrt(v2 + eps)
    t2 = be2 - m2 * s2
    w1 = conv1_w.reshape(Ci, Cin).T.astype(f32) * s2[None, :]     # BN2 scale folded
    w2 = jnp.transpose(conv2_w, (2, 3, 1, 0)).astype(f32)         # HWIO

    x = jnp.transpose(x_nchw, (0, 2, 3, 1)).astype(f32)           # NHWC
    y = jnp.maximum(x * s1 + t1, 0.0)
    hid = jax.lax.conv_general_dilated(
        y.astype(bf16), w1.reshape(1, 1, Cin, Ci).astype(bf16),
        (1, 1), "VALID", dimension_numbers=("NHWC", "HWIO", "NHWC"),
        preferred_element_type=f32)
    a = jnp.maximum(hid + t2, 0.0)
    o = jax.lax.conv_general_dilated(
        a.astype(bf16), w2.astype(bf16),
        (1, 1), ((1, 1), (1, 1)), dimension_numbers=("NHWC", "HWIO", "NHWC"),
        preferred_element_type=f32)
    o_nchw = jnp.transpose(o, (0, 3, 1, 2)).astype(x_nchw.dtype)
    return jnp.concatenate([x_nchw, o_nchw], axis=1)


if __name__ == "__main__":
    # small shapes consistent with the module
    N, Cin, H, W = 2, 4, 16, 16
    growth = 8
    Ci = 4 * growth  # inner_channel

    key = jax.random.PRNGKey(0)
    ks = jax.random.split(key, 11)

    # deterministic synthetic parameters (BatchNorm2d x2 + two bias-free convs)
    g1 = 1.0 + 0.1 * jax.random.normal(ks[0], (Cin,), jnp.float32)
    be1 = 0.1 * jax.random.normal(ks[1], (Cin,), jnp.float32)
    m1 = 0.1 * jax.random.normal(ks[2], (Cin,), jnp.float32)
    v1 = jnp.abs(jax.random.normal(ks[3], (Cin,), jnp.float32)) + 0.5
    g2 = 1.0 + 0.1 * jax.random.normal(ks[4], (Ci,), jnp.float32)
    be2 = 0.1 * jax.random.normal(ks[5], (Ci,), jnp.float32)
    m2 = 0.1 * jax.random.normal(ks[6], (Ci,), jnp.float32)
    v2 = jnp.abs(jax.random.normal(ks[7], (Ci,), jnp.float32)) + 0.5

    conv1_w = 0.1 * jax.random.normal(ks[8], (Ci, Cin, 1, 1), jnp.float32)    # OIHW
    conv2_w = 0.05 * jax.random.normal(ks[9], (growth, Ci, 3, 3), jnp.float32)  # OIHW

    params = (g1, be1, m1, v1, conv1_w, g2, be2, m2, v2, conv2_w)
    x = jax.random.normal(ks[10], (N, Cin, H, W), jnp.float32)

    out = jax.jit(bottleneck_forward)(x, params)
    out = jax.block_until_ready(out)

    ref = _reference(x, params)
    assert out.shape == (N, Cin + growth, H, W), out.shape
    # both paths use bf16 matmul operands with f32 accumulation; residual
    # differences come only from accumulation order / rare bf16 ulp flips.
    np.testing.assert_allclose(np.asarray(out), np.asarray(ref),
                               rtol=1e-2, atol=1e-2)

    print("KERNEL_OK")
</pallas_src>

<mosaic_0001>
module attributes {stable_mosaic.version = 11 : i64} {
  func.func @_bottleneck_kernel(%arg0: i32, %arg1: memref<1x16x64xf32, #tpu.memory_space<vmem>>, %arg2: memref<1x64xf32, #tpu.memory_space<vmem>>, %arg3: memref<1x64xf32, #tpu.memory_space<vmem>>, %arg4: memref<64x512xbf16, #tpu.memory_space<vmem>>, %arg5: memref<1x512xf32, #tpu.memory_space<vmem>>, %arg6: memref<3x512x128xbf16, #tpu.memory_space<vmem>>, %arg7: memref<1x16x128xf32, #tpu.memory_space<vmem>>, %arg8: memref<18x512xf32, #tpu.memory_space<vmem>>) attributes {dimension_semantics = [#tpu.dimension_semantics<parallel>], iteration_bounds = array<i64: 2>, scalar_prefetch = 0 : i64, scratch_operands = 1 : i64, tpu.core_type = #tpu.core_type<tc>, window_params = [{transform_indices = @transform_0, window_bounds = array<i64: 1, 16, 64>}, {pipeline_mode = #tpu.pipeline_mode<synchronous>, transform_indices = @transform_1, window_bounds = array<i64: 1, 64>}, {pipeline_mode = #tpu.pipeline_mode<synchronous>, transform_indices = @transform_2, window_bounds = array<i64: 1, 64>}, {pipeline_mode = #tpu.pipeline_mode<synchronous>, transform_indices = @transform_3, window_bounds = array<i64: 64, 512>}, {pipeline_mode = #tpu.pipeline_mode<synchronous>, transform_indices = @transform_4, window_bounds = array<i64: 1, 512>}, {pipeline_mode = #tpu.pipeline_mode<synchronous>, transform_indices = @transform_5, window_bounds = array<i64: 3, 512, 128>}, {transform_indices = @transform_6, window_bounds = array<i64: 1, 16, 128>}]} {
    %c0 = arith.constant 0 : index
    %c0_0 = arith.constant 0 : index
    %c0_1 = arith.constant 0 : index
    %0 = vector.load %arg1[%c0, %c0_0, %c0_1] : memref<1x16x64xf32, #tpu.memory_space<vmem>>, vector<1x16x64xf32>
    %1 = vector.shape_cast %0 : vector<1x16x64xf32> to vector<16x64xf32>
    %c0_2 = arith.constant 0 : index
    %c0_3 = arith.constant 0 : index
    %2 = vector.load %arg2[%c0_2, %c0_3] : memref<1x64xf32, #tpu.memory_space<vmem>>, vector<1x64xf32>
    %3 = vector.broadcast %2 : vector<1x64xf32> to vector<16x64xf32>
    %4 = arith.mulf %1, %3 : vector<16x64xf32>
    %c0_4 = arith.constant 0 : index
    %c0_5 = arith.constant 0 : index
    %5 = vector.load %arg3[%c0_4, %c0_5] : memref<1x64xf32, #tpu.memory_space<vmem>>, vector<1x64xf32>
    %6 = vector.broadcast %5 : vector<1x64xf32> to vector<16x64xf32>
    %7 = arith.addf %4, %6 : vector<16x64xf32>
    %cst = arith.constant 0.000000e+00 : f32
    %8 = vector.broadcast %cst : f32 to vector<16x64xf32>
    %9 = arith.maximumf %7, %8 : vector<16x64xf32>
    %10 = arith.truncf %9 : vector<16x64xf32> to vector<16x64xbf16>
    %c0_6 = arith.constant 0 : index
    %c0_7 = arith.constant 0 : index
    %11 = vector.load %arg4[%c0_6, %c0_7] : memref<64x512xbf16, #tpu.memory_space<vmem>>, vector<64x512xbf16>
    %cst_8 = arith.constant dense<0.000000e+00> : vector<16x512xf32>
    %12 = tpu.matmul %10, %11, %cst_8 {dimension_numbers = #tpu.dot_dimension_numbers<[1], [0], [0], [1], [0, 0, 1, 1], [], []>} : vector<16x64xbf16>, vector<64x512xbf16>, vector<16x512xf32> -> vector<16x512xf32>
    %c0_9 = arith.constant 0 : index
    %c0_10 = arith.constant 0 : index
    %13 = vector.load %arg5[%c0_9, %c0_10] : memref<1x512xf32, #tpu.memory_space<vmem>>, vector<1x512xf32>
    %14 = vector.broadcast %13 : vector<1x512xf32> to vector<16x512xf32>
    %15 = arith.addf %12, %14 : vector<16x512xf32>
    %cst_11 = arith.constant 0.000000e+00 : f32
    %16 = vector.broadcast %cst_11 : f32 to vector<16x512xf32>
    %17 = arith.maximumf %15, %16 : vector<16x512xf32>
    %cst_12 = arith.constant 0.000000e+00 : f32
    %18 = vector.broadcast %cst_12 : f32 to vector<1x512xf32>
    %c0_13 = arith.constant 0 : index
    %c0_14 = arith.constant 0 : index
    %19 = vector.load %arg8[%c0_13, %c0_14] : memref<18x512xf32, #tpu.memory_space<vmem>>, vector<1x512xf32>
    tpu.vector_store %arg8[%c0_13, %c0_14], %18 {strides = array<i32>} : memref<18x512xf32, #tpu.memory_space<vmem>>, vector<1x512xf32>,
    %cst_15 = arith.constant 0.000000e+00 : f32
    %20 = vector.broadcast %cst_15 : f32 to vector<1x512xf32>
    %c17 = arith.constant 17 : index
    %c0_16 = arith.constant 0 : index
    %21 = vector.load %arg8[%c17, %c0_16] : memref<18x512xf32, #tpu.memory_space<vmem>>, vector<1x512xf32>
    tpu.vector_store %arg8[%c17, %c0_16], %20 {strides = array<i32>} : memref<18x512xf32, #tpu.memory_space<vmem>>, vector<1x512xf32>,
    %c1 = arith.constant 1 : index
    %c0_17 = arith.constant 0 : index
    %22 = vector.load %arg8[%c1, %c0_17] : memref<18x512xf32, #tpu.memory_space<vmem>>, vector<16x512xf32>
    tpu.vector_store %arg8[%c1, %c0_17], %17 {strides = array<i32>} : memref<18x512xf32, #tpu.memory_space<vmem>>, vector<16x512xf32>,
    %cst_18 = arith.constant 0.000000e+00 : f32
    %23 = vector.broadcast %cst_18 : f32 to vector<16x128xf32>
    %c0_19 = arith.constant 0 : index
    %c0_20 = arith.constant 0 : index
    %24 = vector.load %arg8[%c0_19, %c0_20] : memref<18x512xf32, #tpu.memory_space<vmem>>, vector<16x512xf32>
    %25 = arith.truncf %24 : vector<16x512xf32> to vector<16x512xbf16>
    %c0_21 = arith.constant 0 : index
    %c0_22 = arith.constant 0 : index
    %c0_23 = arith.constant 0 : index
    %26 = vector.load %arg6[%c0_21, %c0_22, %c0_23] : memref<3x512x128xbf16, #tpu.memory_space<vmem>>, vector<1x512x128xbf16>
    %27 = vector.shape_cast %26 : vector<1x512x128xbf16> to vector<512x128xbf16>
    %cst_24 = arith.constant dense<0.000000e+00> : vector<16x128xf32>
    %28 = tpu.matmul %25, %27, %cst_24 {dimension_numbers = #tpu.dot_dimension_numbers<[1], [0], [0], [1], [0, 0, 1, 1], [], []>} : vector<16x512xbf16>, vector<512x128xbf16>, vector<16x128xf32> -> vector<16x128xf32>
    %29 = arith.addf %23, %28 : vector<16x128xf32>
    %c1_25 = arith.constant 1 : index
    %c0_26 = arith.constant 0 : index
    %30 = vector.load %arg8[%c1_25, %c0_26] : memref<18x512xf32, #tpu.memory_space<vmem>>, vector<16x512xf32>
    %31 = arith.truncf %30 : vector<16x512xf32> to vector<16x512xbf16>
    %c1_27 = arith.constant 1 : index
    %c0_28 = arith.constant 0 : index
    %c0_29 = arith.constant 0 : index
    %32 = vector.load %arg6[%c1_27, %c0_28, %c0_29] : memref<3x512x128xbf16, #tpu.memory_space<vmem>>, vector<1x512x128xbf16>
    %33 = vector.shape_cast %32 : vector<1x512x128xbf16> to vector<512x128xbf16>
    %cst_30 = arith.constant dense<0.000000e+00> : vector<16x128xf32>
    %34 = tpu.matmul %31, %33, %cst_30 {dimension_numbers = #tpu.dot_dimension_numbers<[1], [0], [0], [1], [0, 0, 1, 1], [], []>} : vector<16x512xbf16>, vector<512x128xbf16>, vector<16x128xf32> -> vector<16x128xf32>
    %35 = arith.addf %29, %34 : vector<16x128xf32>
    %c2 = arith.constant 2 : index
    %c0_31 = arith.constant 0 : index
    %36 = vector.load %arg8[%c2, %c0_31] : memref<18x512xf32, #tpu.memory_space<vmem>>, vector<16x512xf32>
    %37 = arith.truncf %36 : vector<16x512xf32> to vector<16x512xbf16>
    %c2_32 = arith.constant 2 : index
    %c0_33 = arith.constant 0 : index
    %c0_34 = arith.constant 0 : index
    %38 = vector.load %arg6[%c2_32, %c0_33, %c0_34] : memref<3x512x128xbf16, #tpu.memory_space<vmem>>, vector<1x512x128xbf16>
    %39 = vector.shape_cast %38 : vector<1x512x128xbf16> to vector<512x128xbf16>
    %cst_35 = arith.constant dense<0.000000e+00> : vector<16x128xf32>
    %40 = tpu.matmul %37, %39, %cst_35 {dimension_numbers = #tpu.dot_dimension_numbers<[1], [0], [0], [1], [0, 0, 1, 1], [], []>} : vector<16x512xbf16>, vector<512x128xbf16>, vector<16x128xf32> -> vector<16x128xf32>
    %41 = arith.addf %35, %40 : vector<16x128xf32>
    %c0_36 = arith.constant 0 : index
    %c0_37 = arith.constant 0 : index
    %c0_38 = arith.constant 0 : index
    %42 = vector.load %arg7[%c0_36, %c0_37, %c0_38] : memref<1x16x128xf32, #tpu.memory_space<vmem>>, vector<1x16x128xf32>
    %43 = vector.shape_cast %42 : vector<1x16x128xf32> to vector<16x128xf32>
    %44 = vector.shape_cast %41 : vector<16x128xf32> to vector<1x16x128xf32>
    tpu.vector_store %arg7[%c0_36, %c0_37, %c0_38], %44 {strides = array<i32>} : memref<1x16x128xf32, #tpu.memory_space<vmem>>, vector<1x16x128xf32>,
    return
  }
  func.func @transform_0(%arg0: i32) -> (i32, i32, i32) {
    %c0_i32 = arith.constant 0 : i32
    %c0_i32_0 = arith.constant 0 : i32
    %c0_i32_1 = arith.constant 0 : i32
    return %arg0, %c0_i32, %c0_i32_0 : i32, i32, i32
  }
  func.func @transform_1(%arg0: i32) -> (i32, i32) {
    %c0_i32 = arith.constant 0 : i32
    %c0_i32_0 = arith.constant 0 : i32
    %c0_i32_1 = arith.constant 0 : i32
    return %c0_i32, %c0_i32_0 : i32, i32
  }
  func.func @transform_2(%arg0: i32) -> (i32, i32) {
    %c0_i32 = arith.constant 0 : i32
    %c0_i32_0 = arith.constant 0 : i32
    %c0_i32_1 = arith.constant 0 : i32
    return %c0_i32, %c0_i32_0 : i32, i32
  }
  func.func @transform_3(%arg0: i32) -> (i32, i32) {
    %c0_i32 = arith.constant 0 : i32
    %c0_i32_0 = arith.constant 0 : i32
    %c0_i32_1 = arith.constant 0 : i32
    return %c0_i32, %c0_i32_0 : i32, i32
  }
  func.func @transform_4(%arg0: i32) -> (i32, i32) {
    %c0_i32 = arith.constant 0 : i32
    %c0_i32_0 = arith.constant 0 : i32
    %c0_i32_1 = arith.constant 0 : i32
    return %c0_i32, %c0_i32_0 : i32, i32
  }
  func.func @transform_5(%arg0: i32) -> (i32, i32, i32) {
    %c0_i32 = arith.constant 0 : i32
    %c0_i32_0 = arith.constant 0 : i32
    %c0_i32_1 = arith.constant 0 : i32
    %c0_i32_2 = arith.constant 0 : i32
    return %c0_i32, %c0_i32_0, %c0_i32_1 : i32, i32, i32
  }
  func.func @transform_6(%arg0: i32) -> (i32, i32, i32) {
    %c0_i32 = arith.constant 0 : i32
    %c0_i32_0 = arith.constant 0 : i32
    %c0_i32_1 = arith.constant 0 : i32
    return %arg0, %c0_i32, %c0_i32_0 : i32, i32, i32
  }
}

</mosaic_0001>

<bundles_post_ra>
// kernel: tile.28
= control target key start
LH: loop header
LB: loop body
LE: loop exit
PB: predicated region body
PF: predicated region fallthrough
CT: control target
= control target key end

     0   :  { %s28_s0 = inlined_call_operand.vmem [shape: f32[32], index: 0, kind: input, shape index: {}]   ;;  %s29_s1 = inlined_call_operand.vmem [shape: f32[16,32], index: 1, kind: output, shape index: {}]  }
   0x1   :  { %v4_v0 = vld [vmem:[%s28_s0] ss:$0 sm:$0xff] }
   0x2   :  { %5 = vst [vmem:[%s29_s1] sm:$0xff] %v4_v0  ;;  %8 = vst [vmem:[%s29_s1 + $0x8] sm:$0xff] %v4_v0 }

// kernel: tile.29
= control target key start
LH: loop header
LB: loop body
LE: loop exit
PB: predicated region body
PF: predicated region fallthrough
CT: control target
= control target key end

     0   :  { %s57_s8 = smov 96   ;;  %vm3_vm0 = vcmask 261120   ;;  %s59_s15 = smov 64   ;;  %vm9_vm1 = vcmask 1048320   ;;  %vm15_vm2 = vcmask 785920   ;;  %vm21_vm3 = vcmask 523520   ;;  %s94_s0 = inlined_call_operand.vmem [shape: f32[16,32], index: 0, kind: input, shape index: {}]   ;;  %s95_s1 = inlined_call_operand.vmem [shape: f32[1,512], index: 1, kind: output, shape index: {}]  }
   0x1   :  { %v48_v0 = vld [vmem:[%s94_s0 + $0x3] ss:$4 sm:$0xf]   ;;  %v49_v1 = vld [vmem:[%s94_s0 + $0x2] ss:$4 sm:$0xf]  }
   0x2   :  { %7 = vrot.lane.b32.xlu0 %v48_v0, %s57_s8  ;;  %v50_v2 = vld [vmem:[%s94_s0 + $0x1] ss:$4 sm:$0xf]   ;;  %v2_v3 = vld [vmem:[%s94_s0] ss:$4 sm:$0xf]  }
   0x3   :  { %s58_s0 = smov 32   ;;  %4 = vst.msk [vmem:[#allocation0] ss:$8 sm:$0xf] %vm3_vm0, %v2_v3  }
   0x4   :  { %19 = vrot.lane.b32.xlu1 %v50_v2, %s58_s0 }
   0x6   :  { %13 = vrot.lane.b32.xlu0 %v49_v1, %s59_s15 }
  0x74   :  { %v8_v4 = vpop.permute.xlu0 %7  }
  0x75   :  { %10 = vst.msk [vmem:[#allocation0] ss:$8 sm:$0xf] %vm9_vm1, %v8_v4  }
  0x76   :  { %v20_v5 = vpop.permute.xlu1 %19  }
  0x78   :  { %v14_v6 = vpop.permute.xlu0 %13  }
  0x79   :  { %16 = vst.msk [vmem:[#allocation0] ss:$8 sm:$0xf] %vm15_vm2, %v14_v6  }
  0x7a   :  { %22 = vst.msk [vmem:[#allocation0] ss:$8 sm:$0xf] %vm21_vm3, %v20_v5  }
  0x81   :  { %v26_v7 = vld [vmem:[#allocation0] sm:$0x1]  ;;  %v30_v8 = vld [vmem:[#allocation0 + $0x8] sm:$0x1]  ;;  %v35_v9 = vld [vmem:[#allocation0 + $0x10] sm:$0x1] }
  0x82   :  { %28 = vst [vmem:[%s95_s1] sm:$0x1] %v26_v7  ;;  %51 = vst [vmem:[%s95_s1 + $0x1] sm:$0x1] %v30_v8  ;;  %v41_v10 = vld [vmem:[#allocation0 + $0x18] sm:$0x1] }
  0x83   :  { %52 = vst [vmem:[%s95_s1 + $0x2] sm:$0x1] %v35_v9  ;;  %53 = vst [vmem:[%s95_s1 + $0x3] sm:$0x1] %v41_v10 }

// kernel: tile.18
= control target key start
LH: loop header
LB: loop body
LE: loop exit
PB: predicated region body
PF: predicated region fallthrough
CT: control target
= control target key end

     0   :  { %s28_s0 = inlined_call_operand.vmem [shape: f32[4], index: 0, kind: input, shape index: {}]   ;;  %s29_s1 = inlined_call_operand.vmem [shape: f32[16,4], index: 1, kind: output, shape index: {}]  }
   0x1   :  { %v4_v0 = vld [vmem:[%s28_s0] ss:$0 sm:$0xff] }
   0x2   :  { %5 = vst [vmem:[%s29_s1] sm:$0xff] %v4_v0  ;;  %8 = vst [vmem:[%s29_s1 + $0x8] sm:$0xff] %v4_v0 }

// kernel: tile.19
= control target key start
LH: loop header
LB: loop body
LE: loop exit
PB: predicated region body
PF: predicated region fallthrough
CT: control target
= control target key end

     0   :  { %s131_s10 = smov 60   ;;  %s132_s11 = smov 52   ;;  %vm3_vm0 = vcmask 31744   ;;  %vm9_vm1 = vcmask 523744   ;;  %vm15_vm2 = vcmask 490944   ;;  %vm21_vm3 = vcmask 458144   ;;  %s207_s0 = inlined_call_operand.vmem [shape: f32[16,4], index: 0, kind: input, shape index: {}]   ;;  %s208_s1 = inlined_call_operand.vmem [shape: f32[1,64], index: 1, kind: output, shape index: {}]  }
   0x1   :  { %v101_v0 = vld [vmem:[%s207_s0 + $0xf] sm:$0x1]   ;;  %v103_v1 = vld [vmem:[%s207_s0 + $0xd] sm:$0x1]   ;;  %v102_v2 = vld [vmem:[%s207_s0 + $0xe] sm:$0x1]  }
   0x2   :  { %7 = vrot.lane.b32.xlu0 %v101_v0, %s131_s10  ;;  %19 = vrot.lane.b32.xlu1 %v103_v1, %s132_s11  ;;  %v104_v3 = vld [vmem:[%s207_s0 + $0xc] sm:$0x1]   ;;  %s133_s16 = smov 56   ;;  %s134_s17 = smov 48   ;;  %v105_v4 = vld [vmem:[%s207_s0 + $0xb] sm:$0x1]  }
   0x3   :  { %v106_v5 = vld [vmem:[%s207_s0 + $0xa] sm:$0x1]   ;;  %v2_v6 = vld [vmem:[%s207_s0] sm:$0x1]   ;;  %s135_s24 = smov 44   ;;  %s136_s25 = smov 40  }
   0x4   :  { %4 = vst.msk [vmem:[#allocation0] sm:$0x1] %vm3_vm0, %v2_v6   ;;  %v107_v7 = vld [vmem:[%s207_s0 + $0x9] sm:$0x1]   ;;  %v108_v8 = vld [vmem:[%s207_s0 + $0x8] sm:$0x1]  }
   0x5   :  { %s137_s30 = smov 36   ;;  %s138_s2 = smov 32   ;;  %v109_v9 = vld [vmem:[%s207_s0 + $0x7] sm:$0x1]   ;;  %v110_v10 = vld [vmem:[%s207_s0 + $0x6] sm:$0x1]  }
   0x6   :  { %13 = vrot.lane.b32.xlu0 %v102_v2, %s133_s16  ;;  %25 = vrot.lane.b32.xlu1 %v104_v3, %s134_s17  ;;  %s139_s7 = smov 28   ;;  %s140_s8 = smov 24   ;;  %v111_v11 = vld [vmem:[%s207_s0 + $0x5] sm:$0x1]   ;;  %v112_v12 = vld [vmem:[%s207_s0 + $0x4] sm:$0x1]  }
   0x7   :  { %s141_s13 = smov 20   ;;  %s142_s14 = smov 16   ;;  %v113_v13 = vld [vmem:[%s207_s0 + $0x3] sm:$0x1]   ;;  %v114_v14 = vld [vmem:[%s207_s0 + $0x2] sm:$0x1]  }
   0x8   :  { %s143_s19 = smov 12   ;;  %s144_s20 = smov 8   ;;  %v115_v15 = vld [vmem:[%s207_s0 + $0x1] sm:$0x1]   ;;  %vm27_vm4 = vcmask 425344   ;;  %vm33_vm5 = vcmask 392544  }
   0x9   :  { %s145_s0 = smov 4   ;;  %vm39_vm6 = vcmask 359744   ;;  %vm45_vm7 = vcmask 326944   ;;  %vm51_vm8 = vcmask 294144   ;;  %vm57_vm9 = vcmask 261344  }
   0xa   :  { %31 = vrot.lane.b32.xlu0 %v105_v4, %s135_s24  ;;  %37 = vrot.lane.b32.xlu1 %v106_v5, %s136_s25  ;;  %vm63_vm10 = vcmask 228544   ;;  %vm69_vm11 = vcmask 195744   ;;  %vm75_vm12 = vcmask 162944   ;;  %vm81_vm13 = vcmask 130144  }
   0xb   :  { %vm87_vm14 = vcmask 97344   ;;  %vm93_vm15 = vcmask 64544  }
   0xe   :  { %43 = vrot.lane.b32.xlu0 %v107_v7, %s137_s30  ;;  %49 = vrot.lane.b32.xlu1 %v108_v8, %s138_s2 }
  0x12   :  { %55 = vrot.lane.b32.xlu0 %v109_v9, %s139_s7  ;;  %61 = vrot.lane.b32.xlu1 %v110_v10, %s140_s8 }
  0x16   :  { %67 = vrot.lane.b32.xlu0 %v111_v11, %s141_s13  ;;  %73 = vrot.lane.b32.xlu1 %v112_v12, %s142_s14 }
  0x1a   :  { %79 = vrot.lane.b32.xlu0 %v113_v13, %s143_s19  ;;  %85 = vrot.lane.b32.xlu1 %v114_v14, %s144_s20 }
  0x1e   :  { %91 = vrot.lane.b32.xlu0 %v115_v15, %s145_s0 }
  0x74   :  { %v8_v16 = vpop.permute.xlu0 %7   ;;  %v20_v17 = vpop.permute.xlu1 %19  }
  0x75   :  { %10 = vst.msk [vmem:[#allocation0] sm:$0x1] %vm9_vm1, %v8_v16  }
  0x78   :  { %v14_v18 = vpop.permute.xlu0 %13   ;;  %v26_v19 = vpop.permute.xlu1 %25  }
  0x79   :  { %16 = vst.msk [vmem:[#allocation0] sm:$0x1] %vm15_vm2, %v14_v18  }
  0x7a   :  { %22 = vst.msk [vmem:[#allocation0] sm:$0x1] %vm21_vm3, %v20_v17  }
  0x7b   :  { %28 = vst.msk [vmem:[#allocation0] sm:$0x1] %vm27_vm4, %v26_v19  }
  0x7c   :  { %v32_v20 = vpop.permute.xlu0 %31   ;;  %v38_v21 = vpop.permute.xlu1 %37  }
  0x7d   :  { %34 = vst.msk [vmem:[#allocation0] sm:$0x1] %vm33_vm5, %v32_v20  }
  0x7e   :  { %40 = vst.msk [vmem:[#allocation0] sm:$0x1] %vm39_vm6, %v38_v21  }
  0x80   :  { %v44_v22 = vpop.permute.xlu0 %43   ;;  %v50_v23 = vpop.permute.xlu1 %49  }
  0x81   :  { %46 = vst.msk [vmem:[#allocation0] sm:$0x1] %vm45_vm7, %v44_v22  }
  0x82   :  { %52 = vst.msk [vmem:[#allocation0] sm:$0x1] %vm51_vm8, %v50_v23  }
  0x84   :  { %v56_v24 = vpop.permute.xlu0 %55   ;;  %v62_v25 = vpop.permute.xlu1 %61  }
  0x85   :  { %58 = vst.msk [vmem:[#allocation0] sm:$0x1] %vm57_vm9, %v56_v24  }
  0x86   :  { %64 = vst.msk [vmem:[#allocation0] sm:$0x1] %vm63_vm10, %v62_v25  }
  0x88   :  { %v68_v26 = vpop.permute.xlu0 %67   ;;  %v74_v27 = vpop.permute.xlu1 %73  }
  0x89   :  { %70 = vst.msk [vmem:[#allocation0] sm:$0x1] %vm69_vm11, %v68_v26  }
  0x8a   :  { %76 = vst.msk [vmem:[#allocation0] sm:$0x1] %vm75_vm12, %v74_v27  }
  0x8c   :  { %v80_v28 = vpop.permute.xlu0 %79   ;;  %v86_v29 = vpop.permute.xlu1 %85  }
  0x8d   :  { %82 = vst.msk [vmem:[#allocation0] sm:$0x1] %vm81_vm13, %v80_v28  }
  0x8e   :  { %88 = vst.msk [vmem:[#allocation0] sm:$0x1] %vm87_vm14, %v86_v29  }
  0x90   :  { %v92_v30 = vpop.permute.xlu0 %91  }
  0x91   :  { %94 = vst.msk [vmem:[#allocation0] sm:$0x1] %vm93_vm15, %v92_v30  }
  0x98   :  { %v98_v31 = vld [vmem:[#allocation0] sm:$0x1] }
  0x99   :  { %100 = vst [vmem:[%s208_s1] sm:$0x1] %v98_v31 }

// kernel: bottleneck_forward.1
= control target key start
LH: loop header
LB: loop body
LE: loop exit
PB: predicated region body
PF: predicated region fallthrough
CT: control target
= control target key end

     0   :  { %s2307_s21 = smov 0   ;;  %s2708_s0 = inlined_call_operand.vmem [shape: f32[2,16,64], index: 0, kind: input, shape index: {}]   ;;  %s2709_s1 = inlined_call_operand.vmem [shape: f32[1,64], index: 1, kind: input, shape index: {}]   ;;  %s2710_s2 = inlined_call_operand.vmem [shape: f32[1,64], index: 2, kind: input, shape index: {}]   ;;  %s2711_s3 = inlined_call_operand.vmem [shape: bf16[64,512], index: 3, kind: input, shape index: {}]   ;;  %s2712_s4 = inlined_call_operand.vmem [shape: f32[1,512], index: 4, kind: input, shape index: {}]   ;;  %s2713_s5 = inlined_call_operand.vmem [shape: bf16[3,512,128], index: 5, kind: input, shape index: {}]   ;;  %s2714_s6 = inlined_call_operand.vmem [shape: f32[2,16,128], index: 6, kind: output, shape index: {}]  }
   0x1 LB: > { %s1743_s22 = sadd.s32 4294967295, %s2268_s21   ;;  %p1747_p0 = scmp.ge.s32.totalorder %s2268_s21, 1  ;;  %s2268_s21 = sphi %s2307_s21, %s16_s21  }
   0x2   : > { %p212_p1 = scmp.lt.s32.totalorder %s2268_s21, 3 }
   0x4   : > { %p213_p2 = pnand %p1747_p0, %p212_p1 }
   0x5   : > { %v2142_v0 = vld [vmem:[%s2711_s3 + $0x4] ss:$16 sps:$4 sm:$0xff] (!%p213_p2)   ;;  %p242_p3 = scmp.lt.s32.totalorder (!%p213_p2), %s1743_s22, 1  ;;  %v2144_v1 = vld [vmem:[%s2711_s3 + $0xc] ss:$16 sps:$4 sm:$0xff] (!%p213_p2)   ;;  %v2270_v2 = vmov (!%p213_p2), 0   ;;  %v294_v40 = vlaneseq (!%p213_p2) }
   0x6   : > { %216 = sbr.rel (%p213_p2) target bundleno = 550 (0x226), region = 44  ;;  %430 = vmatprep.mubr.bf16.mxu0 (!%p213_p2), %v2270_v2  ;;  %473 = vmatprep.mubr.bf16.mxu1 (!%p213_p2), %v2270_v2  ;;  %v2146_v3 = vld [vmem:[%s2711_s3] ss:$16 sps:$4 sm:$0xff] (!%p213_p2)   ;;  %v2147_v4 = vld [vmem:[%s2711_s3 + $0x8] ss:$16 sps:$4 sm:$0xff] (!%p213_p2)   ;;  %vm394_vm0 = vcmask (!%p213_p2), 523264  }
   0x7   : > { %398 = vmatprep.subr.bf16.mxu0 (!%p213_p2), %v2142_v0  ;;  %441 = vmatprep.subr.bf16.mxu1 (!%p213_p2), %v2144_v1  ;;  %v2148_v5 = vld [vmem:[%s2711_s3 + $0x24] ss:$16 sps:$4 sm:$0xff] (!%p213_p2)   ;;  %v2150_v6 = vld [vmem:[%s2711_s3 + $0x2c] ss:$16 sps:$4 sm:$0xff] (!%p213_p2)   ;;  %v2152_v7 = vld [vmem:[%s2711_s3 + $0x20] ss:$16 sps:$4 sm:$0xff] (!%p213_p2)  }
   0x8   : > { %399 = vmatpush1.bf16.msra.mxu0 (!%p213_p2), %v2146_v3  ;;  %442 = vmatpush1.bf16.msra.mxu1 (!%p213_p2), %v2147_v4  ;;  %v2153_v8 = vld [vmem:[%s2711_s3 + $0x28] ss:$16 sps:$4 sm:$0xff] (!%p213_p2)   ;;  %v2154_v9 = vld [vmem:[%s2711_s3 + $0x44] ss:$16 sps:$4 sm:$0xff] (!%p213_p2)   ;;  %v2156_v10 = vld [vmem:[%s2711_s3 + $0x4c] ss:$16 sps:$4 sm:$0xff] (!%p213_p2)  }
   0x9   : > { %400 = vmatprep.subr.bf16.mxu0 (!%p213_p2), %v2148_v5  ;;  %443 = vmatprep.subr.bf16.mxu1 (!%p213_p2), %v2150_v6  ;;  %v2158_v11 = vld [vmem:[%s2711_s3 + $0x40] ss:$16 sps:$4 sm:$0xff] (!%p213_p2)   ;;  %v2159_v12 = vld [vmem:[%s2711_s3 + $0x48] ss:$16 sps:$4 sm:$0xff] (!%p213_p2)   ;;  %v2160_v13 = vld [vmem:[%s2711_s3 + $0x64] ss:$16 sps:$4 sm:$0xff] (!%p213_p2)  }
   0xa   : > { %v2162_v14 = vld [vmem:[%s2711_s3 + $0x6c] ss:$16 sps:$4 sm:$0xff] (!%p213_p2)   ;;  %v2164_v15 = vld [vmem:[%s2711_s3 + $0x60] ss:$16 sps:$4 sm:$0xff] (!%p213_p2)   ;;  %v2165_v16 = vld [vmem:[%s2711_s3 + $0x68] ss:$16 sps:$4 sm:$0xff] (!%p213_p2)  }
   0xb   : > { %v1752_v19 = vld [vmem:[%s2709_s1] ss:$0 sm:$0xff] (!%p213_p2)  ;;  %v2170_v32 = vld [vmem:[%s2713_s5 + $0x148] sm:$0xff] (!%p213_p2)   ;;  %v2174_v36 = vld [vmem:[%s2713_s5 + $0x150] sm:$0xff] (!%p213_p2)   ;;  %vm494_vm1 = vcmp.lt.s32.totalorder (!%p213_p2), %v294_v40, 512  ;;  %v2271_v43 = vmov (!%p213_p2), 0.0  }
   0xc   : > { %401 = vmatpush1.bf16.msra.mxu0 (!%p213_p2), %v2152_v7  ;;  %444 = vmatpush1.bf16.msra.mxu1 (!%p213_p2), %v2153_v8  ;;  %v1753_v20 = vld [vmem:[%s2710_s2] ss:$0 sm:$0xff] (!%p213_p2)  ;;  %v2171_v33 = vld [vmem:[%s2713_s5 + $0x1c8] sm:$0xff] (!%p213_p2)   ;;  %v2175_v37 = vld [vmem:[%s2713_s5 + $0x1d0] sm:$0xff] (!%p213_p2)   ;;  %v295_v0 = vshrl.u32 (!%p213_p2), %v294_v40, 7  ;;  %vm509_vm2 = vcmask (!%p213_p2), 1040384  }
   0xd   : > { %s2716_s22 = smov (!%p242_p3, %s1743_s22), 1  ;;  %402 = vmatprep.subr.bf16.mxu0 %v2154_v9  ;;  %445 = vmatprep.subr.bf16.mxu1 %v2156_v10  ;;  %v2166_v23 = vld [vmem:[%s2713_s5 + $0x140] sm:$0xff]   ;;  %v2172_v34 = vld [vmem:[%s2713_s5 + $0x108] sm:$0xff]   ;;  %v2176_v38 = vld [vmem:[%s2713_s5 + $0x110] sm:$0xff]   ;;  %vm703_vm3 = vsmask.f32 7424 }
   0xe   : > { %s1998_s13 = sshll.u32 %s2716_s22, 4  ;;  %v2167_v24 = vld [vmem:[%s2713_s5 + $0x1c0] sm:$0xff]   ;;  %v2173_v35 = vld [vmem:[%s2713_s5 + $0x188] sm:$0xff]   ;;  %v2177_v39 = vld [vmem:[%s2713_s5 + $0x190] sm:$0xff]   ;;  %v296_v1 = vsub.s32 0, %v295_v0  ;;  %v304_v2 = vsub.s32 2, %v295_v0 }
   0xf   : > { %s246_s28 = scalar_lea.vmem %s2708_s0, %s1998_s13  ;;  %v2168_v29 = vld [vmem:[%s2713_s5 + $0x100] sm:$0xff]   ;;  %v2178_v41 = vld [vmem:[%s2713_s5 + $0x158] sm:$0xff]   ;;  %496 = vst.msk [vmem:[#allocation2] ss:$8 sm:$0xf] %vm494_vm1, %v2271_v43  ;;  %v2186_v50 = vld [vmem:[%s2713_s5 + $0x168] sm:$0xff]   ;;  %s251_s27 = scalar_lea.vmem %s2714_s6, %s1998_s13 }
  0x10   : > { %v253_v17 = vld [vmem:[%s246_s28] sm:$0xff]  ;;  %v254_v18 = vld [vmem:[%s246_s28 + $0x8] sm:$0xff]  ;;  %403 = vmatpush1.bf16.msra.mxu0 %v2158_v11  ;;  %446 = vmatpush1.bf16.msra.mxu1 %v2159_v12  ;;  %v2179_v42 = vld [vmem:[%s2713_s5 + $0x1d8] sm:$0xff]   ;;  %499 = vst.msk [vmem:[#allocation2 + $0x41] ss:$8 sm:$0xf] %vm494_vm1, %v2271_v43 }
  0x11   : > { %v262_v21 = vmul.f32 %v1752_v19, %v253_v17  ;;  %v263_v22 = vmul.f32 %v1752_v19, %v254_v18  ;;  %404 = vmatprep.subr.bf16.mxu0 %v2160_v13  ;;  %447 = vmatprep.subr.bf16.mxu1 %v2162_v14  ;;  %v2169_v30 = vld [vmem:[%s2713_s5 + $0x180] sm:$0xff]   ;;  %v2180_v44 = vld [vmem:[%s2713_s5 + $0x118] sm:$0xff]   ;;  %v2187_v51 = vld [vmem:[%s2713_s5 + $0x1e8] sm:$0xff]   ;;  %v300_v4 = vsub.s32 1, %v295_v0  ;;  %v308_v5 = vsub.s32 3, %v295_v0 }
  0x12   : > { %v2181_v45 = vld [vmem:[%s2713_s5 + $0x198] sm:$0xff]   ;;  %v2182_v46 = vld [vmem:[%s2713_s5 + $0x160] sm:$0xff]   ;;  %v2188_v52 = vld [vmem:[%s2713_s5 + $0x128] sm:$0xff]   ;;  %vm1393_vm4 = vcmask 1046528  }
  0x13   : > { %v271_v25 = vadd.f32 %v1753_v20, %v262_v21  ;;  %v272_v26 = vadd.f32 %v1753_v20, %v263_v22  ;;  %v2183_v47 = vld [vmem:[%s2713_s5 + $0x1e0] sm:$0xff]   ;;  %v2189_v53 = vld [vmem:[%s2713_s5 + $0x1a8] sm:$0xff]   ;;  %v2190_v54 = vld [vmem:[%s2713_s5 + $0x170] sm:$0xff]  }
  0x14   : > { %405 = vmatpush1.bf16.msra.mxu0 %v2164_v15  ;;  %448 = vmatpush1.bf16.msra.mxu1 %v2165_v16  ;;  %v2184_v48 = vld [vmem:[%s2713_s5 + $0x120] sm:$0xff]   ;;  %v2191_v55 = vld [vmem:[%s2713_s5 + $0x1f0] sm:$0xff]   ;;  %v2194_v58 = vld [vmem:[%s2713_s5 + $0x178] sm:$0xff]  }
  0x15   : > { %v273_v27 = vmax.f32 %v271_v25, 0.0  ;;  %v274_v28 = vmax.f32 %v272_v26, 0.0  ;;  %2000 = vmatprep.subr.bf16.mxu0 %v2166_v23  ;;  %2022 = vmatprep.subr.bf16.mxu1 %v2167_v24  ;;  %v2185_v49 = vld [vmem:[%s2713_s5 + $0x1a0] sm:$0xff]   ;;  %v2192_v56 = vld [vmem:[%s2713_s5 + $0x130] sm:$0xff]   ;;  %v2195_v59 = vld [vmem:[%s2713_s5 + $0x1f8] sm:$0xff]  }
  0x16   : > { %v2193_v57 = vld [vmem:[%s2713_s5 + $0x1b0] sm:$0xff]   ;;  %v2196_v60 = vld [vmem:[%s2713_s5 + $0x138] sm:$0xff]   ;;  %v2198_v62 = vld [vmem:[%s2713_s5 + $0x40] sm:$0xff]  }
  0x17   : > { %v275_v31 = vpack.c.bf16 %v274_v28, %v273_v27  ;;  %v2197_v61 = vld [vmem:[%s2713_s5 + $0x1b8] sm:$0xff]   ;;  %v2199_v63 = vld [vmem:[%s2713_s5 + $0xc0] sm:$0xff]  }
  0x18   : > { %v292_v3 = vld [vmem:[%s2712_s4] sm:$0xf] }
  0x19   : > { %1770 = vmatmul.mubr.msk.bf16.vlgmr.msra.gmra.mrb[0].mxu0 %vm394_vm0, %v275_v31  ;;  %1771 = vmatmul.mubr.msk.bf16.vlgmr.msra.gmra.mrb[0].mxu1 %vm394_vm0, %v275_v31  ;;  %v297_v6 = vrot.slane %v292_v3, %v296_v1  ;;  %v305_v7 = vrot.slane %v292_v3, %v304_v2  ;;  %v301_v8 = vrot.slane %v292_v3, %v300_v4 }
  0x1a   : > { %2001 = vmatpush3.bf16.msra.mxu0 %v2168_v29  ;;  %2023 = vmatpush3.bf16.msra.mxu1 %v2169_v30  ;;  %v309_v9 = vrot.slane %v292_v3, %v308_v5 }
  0x1b   : > { %2002 = vmatprep.subr.bf16.mxu0 %v2170_v32  ;;  %2024 = vmatprep.subr.bf16.mxu1 %v2171_v33 }
  0x1e   : > { %2003 = vmatpush3.bf16.msra.mxu0 %v2172_v34  ;;  %2025 = vmatpush3.bf16.msra.mxu1 %v2173_v35 }
  0x1f   : > { %2004 = vmatprep.subr.bf16.mxu0 %v2174_v36  ;;  %2026 = vmatprep.subr.bf16.mxu1 %v2175_v37 }
  0x22   : > { %2005 = vmatpush3.bf16.msra.mxu0 %v2176_v38  ;;  %2027 = vmatpush3.bf16.msra.mxu1 %v2177_v39 }
  0x23   : > { %2006 = vmatprep.subr.bf16.mxu0 %v2178_v41  ;;  %2028 = vmatprep.subr.bf16.mxu1 %v2179_v42 }
  0x26   : > { %2007 = vmatpush3.bf16.msra.mxu0 %v2180_v44  ;;  %2029 = vmatpush3.bf16.msra.mxu1 %v2181_v45 }
  0x27   : > { %2008 = vmatprep.subr.bf16.mxu0 %v2182_v46  ;;  %2030 = vmatprep.subr.bf16.mxu1 %v2183_v47 }
  0x2a   : > { %2009 = vmatpush3.bf16.msra.mxu0 %v2184_v48  ;;  %2031 = vmatpush3.bf16.msra.mxu1 %v2185_v49 }
  0x2b   : > { %2010 = vmatprep.subr.bf16.mxu0 %v2186_v50  ;;  %2032 = vmatprep.subr.bf16.mxu1 %v2187_v51 }
  0x2e   : > { %2011 = vmatpush3.bf16.msra.mxu0 %v2188_v52  ;;  %2033 = vmatpush3.bf16.msra.mxu1 %v2189_v53 }
  0x2f   : > { %2012 = vmatprep.subr.bf16.mxu0 %v2190_v54  ;;  %2034 = vmatprep.subr.bf16.mxu1 %v2191_v55 }
  0x32   : > { %2013 = vmatpush3.bf16.msra.mxu0 %v2192_v56  ;;  %2035 = vmatpush3.bf16.msra.mxu1 %v2193_v57 }
  0x33   : > { %2014 = vmatprep.subr.bf16.mxu0 %v2194_v58  ;;  %2036 = vmatprep.subr.bf16.mxu1 %v2195_v59 }
  0x36   : > { %2015 = vmatpush3.bf16.msra.mxu0 %v2196_v60  ;;  %2037 = vmatpush3.bf16.msra.mxu1 %v2197_v61 }
  0x37   : > { %2044 = vmatprep.subr.bf16.mxu0 %v2198_v62  ;;  %2066 = vmatprep.subr.bf16.mxu1 %v2199_v63 }
  0xec   : > { %v432_v10 = vpop.f32.mrb[0].mxu0  ;;  %v475_v11 = vpop.f32.mrb[0].mxu1 }
  0xed   : > { %v433_v12 = vadd.f32 %v432_v10, %v297_v6  ;;  %v476_v13 = vadd.f32 %v475_v11, %v305_v7  ;;  %v434_v14 = vpop.f32.mrb[1].mxu0  ;;  %v477_v15 = vpop.f32.mrb[1].mxu1 }
  0xee   : > { %v435_v16 = vadd.f32 %v434_v14, %v301_v8  ;;  %v478_v17 = vadd.f32 %v477_v15, %v309_v9  ;;  %v436_v18 = vpop.f32.mrb[2].mxu0  ;;  %v479_v19 = vpop.f32.mrb[2].mxu1 }
  0xef   : > { %v484_v20 = vmax.f32 %v433_v12, 0.0  ;;  %v486_v21 = vmax.f32 %v476_v13, 0.0  ;;  %v437_v22 = vadd.f32 %v436_v18, %v297_v6  ;;  %v480_v23 = vadd.f32 %v479_v19, %v305_v7  ;;  %v438_v24 = vpop.f32.mrb[3].mxu0  ;;  %v481_v25 = vpop.f32.mrb[3].mxu1 }
  0xf0   : > { %v485_v26 = vmax.f32 %v435_v16, 0.0  ;;  %v487_v27 = vmax.f32 %v478_v17, 0.0  ;;  %v439_v28 = vadd.f32 %v438_v24, %v301_v8  ;;  %v482_v29 = vadd.f32 %v481_v25, %v309_v9  ;;  %v2202_v25 = vld [vmem:[%s2713_s5 + $0x48] sm:$0xff]  }
  0xf1   : > { %v510_v30 = vrot.slane %v484_v20, 7  ;;  %v512_v31 = vrot.slane %v486_v21, 7  ;;  %v488_v32 = vmax.f32 %v437_v22, 0.0  ;;  %v490_v33 = vmax.f32 %v480_v23, 0.0  ;;  %v2200_v21 = vld [vmem:[%s2713_s5] sm:$0xff]  }
  0xf2   : > { %v511_v34 = vrot.slane %v485_v26, 7  ;;  %v513_v35 = vrot.slane %v487_v27, 7  ;;  %v489_v36 = vmax.f32 %v439_v28, 0.0  ;;  %v491_v37 = vmax.f32 %v482_v29, 0.0  ;;  %v2201_v29 = vld [vmem:[%s2713_s5 + $0x80] sm:$0xff]  }
  0xf3   : > { %534 = vst [vmem:[#allocation2] sm:$0xfe] %v510_v30  ;;  %536 = vst [vmem:[#allocation2 + $0x10] sm:$0xfe] %v512_v31  ;;  %v514_v38 = vrot.slane %v488_v32, 7  ;;  %v518_v39 = vrot.slane %v490_v33, 7 }
  0xf4   : > { %535 = vst [vmem:[#allocation2 + $0x8] sm:$0xfe] %v511_v34  ;;  %537 = vst [vmem:[#allocation2 + $0x18] sm:$0xfe] %v513_v35  ;;  %v516_v40 = vrot.slane %v489_v36, 7  ;;  %v520_v41 = vrot.slane %v491_v37, 7 }
  0xf5   : > { %v2483_v42 = vsel %vm509_vm2, %v510_v30, %v514_v38  ;;  %542 = vst [vmem:[#allocation2 + $0x40] sm:$0x1] %v514_v38  ;;  %v2486_v43 = vsel %vm509_vm2, %v512_v31, %v518_v39  ;;  %544 = vst [vmem:[#allocation2 + $0x50] sm:$0x1] %v518_v39  ;;  %v2203_v31 = vld [vmem:[%s2713_s5 + $0xc8] sm:$0xff]   ;;  %v2207_v37 = vld [vmem:[%s2713_s5 + $0xd0] sm:$0xff]  }
  0xf6   : > { %v2489_v44 = vsel %vm509_vm2, %v511_v34, %v516_v40  ;;  %543 = vst [vmem:[#allocation2 + $0x48] sm:$0x1] %v516_v40  ;;  %v2492_v45 = vsel %vm509_vm2, %v513_v35, %v520_v41  ;;  %545 = vst [vmem:[#allocation2 + $0x58] sm:$0x1] %v520_v41  ;;  %v2204_v34 = vld [vmem:[%s2713_s5 + $0x8] sm:$0xff]   ;;  %v2206_v35 = vld [vmem:[%s2713_s5 + $0x50] sm:$0xff]  }
  0xf7   : > { %v2205_v36 = vld [vmem:[%s2713_s5 + $0x88] sm:$0xff]   ;;  %v2208_v38 = vld [vmem:[%s2713_s5 + $0x10] sm:$0xff]   ;;  %v2210_v39 = vld [vmem:[%s2713_s5 + $0x58] sm:$0xff]  }
  0xf8   : > { %v2209_v40 = vld [vmem:[%s2713_s5 + $0x90] sm:$0xff]   ;;  %v2211_v41 = vld [vmem:[%s2713_s5 + $0xd8] sm:$0xff]  }
  0xfa   : > { %v622_v46 = vld [vmem:[#allocation2] sm:$0xfe]  ;;  %v624_v47 = vld [vmem:[#allocation2 + $0x10] sm:$0xfe] }
  0xfb   : > { %v623_v48 = vld [vmem:[#allocation2 + $0x8] sm:$0xfe]  ;;  %v625_v49 = vld [vmem:[#allocation2 + $0x18] sm:$0xfe]  ;;  %v630_v50 = vpack.c.bf16 %v2483_v42, %v622_v46  ;;  %v632_v60 = vpack.c.bf16 %v2486_v43, %v624_v47  ;;  %v2214_v47 = vld [vmem:[%s2713_s5 + $0x60] sm:$0xff]  }
  0xfc   : > { %v631_v51 = vpack.c.bf16 %v2489_v44, %v623_v48  ;;  %v633_v52 = vpack.c.bf16 %v2492_v45, %v625_v49  ;;  %v626_v53 = vld [vmem:[#allocation2 + $0x40] sm:$0x1]  ;;  %v628_v54 = vld [vmem:[#allocation2 + $0x50] sm:$0x1]  ;;  %v547_v17 = vld [vmem:[#allocation2 + $0x8] sm:$0xff] }
  0xfd   : > { %v627_v55 = vld [vmem:[#allocation2 + $0x48] sm:$0x1]  ;;  %v629_v56 = vld [vmem:[#allocation2 + $0x58] sm:$0x1]  ;;  %v634_v57 = vpack.c.bf16 %v626_v53, %v626_v53  ;;  %v705_v58 = vshrl.u32 %v630_v50, 16  ;;  %v707_v59 = vshll.u32 %v630_v50, 16  ;;  %v636_v0 = vpack.c.bf16 %v628_v54, %v628_v54 }
  0xfe   : > { %v635_v61 = vpack.c.bf16 %v627_v55, %v627_v55  ;;  %v719_v62 = vshll.u32 %v631_v51, 16  ;;  %v637_v63 = vpack.c.bf16 %v629_v56, %v629_v56  ;;  %v717_v1 = vshrl.u32 %v631_v51, 16  ;;  %v549_v24 = vld [vmem:[#allocation2 + $0x18] sm:$0xff]  ;;  %v2215_v49 = vld [vmem:[%s2713_s5 + $0xe0] sm:$0xff]   ;;  %v2218_v51 = vld [vmem:[%s2713_s5 + $0x68] sm:$0xff]  }
  0xff   : > { %v743_v2 = vshll.u32 %v633_v52, 16  ;;  %v709_v3 = vrot.slane %v707_v59, 1  ;;  %v712_v4 = vshll.u32 %v634_v57, 16  ;;  %v741_v7 = vshrl.u32 %v633_v52, 16  ;;  %v2212_v46 = vld [vmem:[%s2713_s5 + $0x18] sm:$0xff]   ;;  %v2216_v50 = vld [vmem:[%s2713_s5 + $0x20] sm:$0xff]  }
 0x100   : > { %v721_v5 = vrot.slane %v719_v62, 1  ;;  %v724_v6 = vshll.u32 %v635_v61, 16  ;;  %v748_v8 = vshll.u32 %v637_v63, 16  ;;  %v731_v12 = vshll.u32 %v632_v60, 16  ;;  %v2213_v48 = vld [vmem:[%s2713_s5 + $0x98] sm:$0xff]   ;;  %v2217_v52 = vld [vmem:[%s2713_s5 + $0xa0] sm:$0xff]  }
 0x101   : > { %v745_v9 = vrot.slane %v743_v2, 1  ;;  %v710_v10 = vor.u32 %v709_v3, %v705_v58  ;;  %v714_v11 = vrot.slane %v712_v4, 1  ;;  %v736_v16 = vshll.u32 %v636_v0, 16  ;;  %v2219_v53 = vld [vmem:[%s2713_s5 + $0xe8] sm:$0xff]   ;;  %v2222_v55 = vld [vmem:[%s2713_s5 + $0x70] sm:$0xff]   ;;  %v2227_v0 = vld [vmem:[%s2713_s5 + $0xf8] sm:$0xff]  }
 0x102   : > { %v722_v13 = vor.u32 %v721_v5, %v717_v1  ;;  %v726_v14 = vrot.slane %v724_v6, 1  ;;  %v750_v15 = vrot.slane %v748_v8, 1  ;;  %v729_v19 = vshrl.u32 %v632_v60, 16  ;;  %v2220_v54 = vld [vmem:[%s2713_s5 + $0x28] sm:$0xff]   ;;  %v2223_v57 = vld [vmem:[%s2713_s5 + $0xf0] sm:$0xff]   ;;  %v2226_v60 = vld [vmem:[%s2713_s5 + $0x78] sm:$0xff]  }
 0x103   : > { %v746_v18 = vor.u32 %v745_v9, %v741_v7  ;;  %v733_v20 = vrot.slane %v731_v12, 1  ;;  %v738_v23 = vrot.slane %v736_v16, 1  ;;  %v715_v27 = vsel %vm703_vm3, %v710_v10, %v714_v11  ;;  %v2221_v56 = vld [vmem:[%s2713_s5 + $0xa8] sm:$0xff]   ;;  %v2224_v58 = vld [vmem:[%s2713_s5 + $0x30] sm:$0xff]   ;;  %v1311_v63 = vld [vmem:[#allocation2 + $0x58] sm:$0x3] }
 0x104   : > { %v727_v22 = vsel %vm703_vm3, %v722_v13, %v726_v14  ;;  %v555_v30 = vpack.c.bf16 %v2489_v44, %v547_v17  ;;  %v557_v33 = vpack.c.bf16 %v2492_v45, %v549_v24  ;;  %v1309_v59 = vld [vmem:[#allocation2 + $0x48] sm:$0x3]  ;;  %v2225_v61 = vld [vmem:[%s2713_s5 + $0xb0] sm:$0xff]   ;;  %v1305_v62 = vld [vmem:[#allocation2 + $0x8] sm:$0xfc]  ;;  %v1319_v6 = vpack.c.bf16 %v1311_v63, %v1311_v63 }
 0x105   : > { %980 = vmatprep.mubr.bf16.mxu0 %v727_v22  ;;  %v751_v26 = vsel %vm703_vm3, %v746_v18, %v750_v15  ;;  %v734_v28 = vor.u32 %v733_v20, %v729_v19  ;;  %v1317_v1 = vpack.c.bf16 %v1309_v59, %v1309_v59  ;;  %v2228_v2 = vld [vmem:[%s2713_s5 + $0x38] sm:$0xff]   ;;  %v2230_v4 = vld [vmem:[%s2713_s5 + $0x240] sm:$0xff]   ;;  %v1313_v5 = vpack.c.bf16 %v2489_v44, %v1305_v62  ;;  %v548_v12 = vld [vmem:[#allocation2 + $0x10] sm:$0xff] }
 0x106   : > { %1021 = vmatprep.mubr.bf16.mxu1 %v751_v26  ;;  %981 = vmatmul.mubr.bf16.vlgmr.msra.gmra.mrb[4].mxu0 %v715_v27  ;;  %v1307_v3 = vld [vmem:[#allocation2 + $0x18] sm:$0xfc]  ;;  %v546_v8 = vld [vmem:[#allocation2] sm:$0xff]  ;;  %v1404_v15 = vrot.slane %v1319_v6, 1  ;;  %v2234_v16 = vld [vmem:[%s2713_s5 + $0x248] sm:$0xff]   ;;  %v556_v17 = vpack.c.bf16 %v2486_v43, %v548_v12 }
 0x107   : > { %v739_v32 = vsel %vm703_vm3, %v734_v28, %v738_v23  ;;  %2045 = vmatpush3.bf16.msra.mxu0 %v2200_v21  ;;  %1254 = vmatprep.mubr.bf16.mxu0 %v555_v30  ;;  %v2229_v7 = vld [vmem:[%s2713_s5 + $0xb8] sm:$0xff]   ;;  %v2231_v9 = vld [vmem:[%s2713_s5 + $0x2c0] sm:$0xff]   ;;  %v1398_v10 = vrot.slane %v1317_v1, 1  ;;  %v1315_v11 = vpack.c.bf16 %v2492_v45, %v1307_v3  ;;  %v554_v13 = vpack.c.bf16 %v2483_v42, %v546_v8  ;;  %v2235_v20 = vld [vmem:[%s2713_s5 + $0x2c8] sm:$0xff]  }
 0x108   : > { %1022 = vmatmul.mubr.bf16.vlgmr.msra.gmra.mrb[4].mxu1 %v739_v32  ;;  %2046 = vmatprep.subr.bf16.mxu0 %v2202_v25  ;;  %v2232_v44 = vld [vmem:[%s2713_s5 + $0x200] sm:$0xff]   ;;  %v1397_v14 = vrot.slane %v1313_v5, 1  ;;  %v2236_v21 = vld [vmem:[%s2713_s5 + $0x208] sm:$0xff]   ;;  %v2238_v23 = vld [vmem:[%s2713_s5 + $0x250] sm:$0xff]  }
 0x109   : > { %2067 = vmatpush3.bf16.msra.mxu1 %v2201_v29  ;;  %1295 = vmatprep.mubr.bf16.mxu1 %v557_v33  ;;  %v2233_v45 = vld [vmem:[%s2713_s5 + $0x280] sm:$0xff]   ;;  %v1403_v19 = vrot.slane %v1315_v11, 1  ;;  %v2237_v24 = vld [vmem:[%s2713_s5 + $0x288] sm:$0xff]   ;;  %v2239_v25 = vld [vmem:[%s2713_s5 + $0x2d0] sm:$0xff]  }
 0x10a   : > { %2068 = vmatprep.subr.bf16.mxu1 %v2203_v31  ;;  %v1399_v18 = vsel %vm1393_vm4, %v1397_v14, %v1398_v10  ;;  %v2240_v26 = vld [vmem:[%s2713_s5 + $0x210] sm:$0xff]   ;;  %v2242_v27 = vld [vmem:[%s2713_s5 + $0x258] sm:$0xff]   ;;  %v2246_v31 = vld [vmem:[%s2713_s5 + $0x260] sm:$0xff]  }
 0x10b   : > { %2047 = vmatpush3.bf16.msra.mxu0 %v2204_v34  ;;  %v1405_v22 = vsel %vm1393_vm4, %v1403_v19, %v1404_v15  ;;  %v2241_v28 = vld [vmem:[%s2713_s5 + $0x290] sm:$0xff]   ;;  %v2243_v29 = vld [vmem:[%s2713_s5 + $0x2d8] sm:$0xff]   ;;  %v2247_v33 = vld [vmem:[%s2713_s5 + $0x2e0] sm:$0xff]  }
 0x10c   : > { %2048 = vmatprep.subr.bf16.mxu0 %v2206_v35  ;;  %v2244_v30 = vld [vmem:[%s2713_s5 + $0x218] sm:$0xff]   ;;  %v2248_v34 = vld [vmem:[%s2713_s5 + $0x220] sm:$0xff]   ;;  %v2250_v35 = vld [vmem:[%s2713_s5 + $0x268] sm:$0xff]  }
 0x10d   : > { %2069 = vmatpush3.bf16.msra.mxu1 %v2205_v36  ;;  %v2245_v32 = vld [vmem:[%s2713_s5 + $0x298] sm:$0xff]   ;;  %v2249_v36 = vld [vmem:[%s2713_s5 + $0x2a0] sm:$0xff]  }
 0x10e   : > { %2070 = vmatprep.subr.bf16.mxu1 %v2207_v37  ;;  %v2251_v37 = vld [vmem:[%s2713_s5 + $0x2e8] sm:$0xff]  }
 0x10f   : > { %2049 = vmatpush3.bf16.msra.mxu0 %v2208_v38  ;;  %v2252_v38 = vld [vmem:[%s2713_s5 + $0x228] sm:$0xff]  }
 0x110   : > { %2050 = vmatprep.subr.bf16.mxu0 %v2210_v39  ;;  %v2254_v39 = vld [vmem:[%s2713_s5 + $0x270] sm:$0xff]  }
 0x111   : > { %2071 = vmatpush3.bf16.msra.mxu1 %v2209_v40  ;;  %v2253_v40 = vld [vmem:[%s2713_s5 + $0x2a8] sm:$0xff]  }
 0x112   : > { %2072 = vmatprep.subr.bf16.mxu1 %v2211_v41  ;;  %v2255_v41 = vld [vmem:[%s2713_s5 + $0x2f0] sm:$0xff]  }
 0x113   : > { %2051 = vmatpush3.bf16.msra.mxu0 %v2212_v46  ;;  %v1308_v46 = vld [vmem:[#allocation2 + $0x40] sm:$0x3] }
 0x114   : > { %2052 = vmatprep.subr.bf16.mxu0 %v2214_v47  ;;  %v2256_v47 = vld [vmem:[%s2713_s5 + $0x230] sm:$0xff]  }
 0x115   : > { %2073 = vmatpush3.bf16.msra.mxu1 %v2213_v48  ;;  %v2258_v48 = vld [vmem:[%s2713_s5 + $0x278] sm:$0xff]  }
 0x116   : > { %2074 = vmatprep.subr.bf16.mxu1 %v2215_v49  ;;  %v1304_v49 = vld [vmem:[#allocation2] sm:$0xfc] }
 0x117   : > { %2053 = vmatpush3.bf16.msra.mxu0 %v2216_v50  ;;  %v1310_v50 = vld [vmem:[#allocation2 + $0x50] sm:$0x3] }
 0x118   : > { %2054 = vmatprep.subr.bf16.mxu0 %v2218_v51  ;;  %v2257_v51 = vld [vmem:[%s2713_s5 + $0x2b0] sm:$0xff]  }
 0x119   : > { %2075 = vmatpush3.bf16.msra.mxu1 %v2217_v52  ;;  %v1316_v52 = vpack.c.bf16 %v1308_v46, %v1308_v46 }
 0x11a   : > { %2076 = vmatprep.subr.bf16.mxu1 %v2219_v53  ;;  %v2259_v53 = vld [vmem:[%s2713_s5 + $0x2f8] sm:$0xff]  }
 0x11b   : > { %2055 = vmatpush3.bf16.msra.mxu0 %v2220_v54  ;;  %v1306_v54 = vld [vmem:[#allocation2 + $0x10] sm:$0xfc]  ;;  %v1395_v59 = vrot.slane %v1316_v52, 1 }
 0x11c   : > { %2056 = vmatprep.subr.bf16.mxu0 %v2222_v55  ;;  %v2260_v55 = vld [vmem:[%s2713_s5 + $0x238] sm:$0xff]  }
 0x11d   : > { %2077 = vmatpush3.bf16.msra.mxu1 %v2221_v56  ;;  %v1312_v56 = vpack.c.bf16 %v2483_v42, %v1304_v49 }
 0x11e   : > { %2078 = vmatprep.subr.bf16.mxu1 %v2223_v57  ;;  %v1318_v57 = vpack.c.bf16 %v1310_v50, %v1310_v50 }
 0x11f   : > { %2057 = vmatpush3.bf16.msra.mxu0 %v2224_v58  ;;  %v2261_v58 = vld [vmem:[%s2713_s5 + $0x2b8] sm:$0xff]  }
 0x120   : > { %2058 = vmatprep.subr.bf16.mxu0 %v2226_v60  ;;  %v1314_v60 = vpack.c.bf16 %v2486_v43, %v1306_v54  ;;  %v1401_v62 = vrot.slane %v1318_v57, 1 }
 0x121   : > { %2079 = vmatpush3.bf16.msra.mxu1 %v2225_v61  ;;  %v1394_v61 = vrot.slane %v1312_v56, 1 }
 0x122   : > { %2080 = vmatprep.subr.bf16.mxu1 %v2227_v0  ;;  %v1400_v0 = vrot.slane %v1314_v60, 1 }
 0x123   : > { %2059 = vmatpush3.bf16.msra.mxu0 %v2228_v2  ;;  %v1396_v63 = vsel %vm1393_vm4, %v1394_v61, %v1395_v59 }
 0x124   : > { %2088 = vmatprep.subr.bf16.mxu0 %v2230_v4  ;;  %v1402_v42 = vsel %vm1393_vm4, %v1400_v0, %v1401_v62 }
 0x125   : > { %2081 = vmatpush3.bf16.msra.mxu1 %v2229_v7 }
 0x126   : > { %1255 = vmatmul.mubr.bf16.vlgmr.msra.gmra.mrb[8].mxu0 %v554_v13  ;;  %2110 = vmatprep.subr.bf16.mxu1 %v2231_v9 }
 0x127   : > { %2089 = vmatpush3.bf16.msra.mxu0 %v2232_v44  ;;  %1634 = vmatprep.mubr.bf16.mxu0 %v1399_v18 }
 0x128   : > { %1296 = vmatmul.mubr.bf16.vlgmr.msra.gmra.mrb[8].mxu1 %v556_v17  ;;  %2090 = vmatprep.subr.bf16.mxu0 %v2234_v16 }
 0x129   : > { %2111 = vmatpush3.bf16.msra.mxu1 %v2233_v45  ;;  %1675 = vmatprep.mubr.bf16.mxu1 %v1405_v22 }
 0x12a   : > { %2112 = vmatprep.subr.bf16.mxu1 %v2235_v20 }
 0x12b   : > { %2091 = vmatpush3.bf16.msra.mxu0 %v2236_v21 }
 0x12c   : > { %2092 = vmatprep.subr.bf16.mxu0 %v2238_v23 }
 0x12d   : > { %2113 = vmatpush3.bf16.msra.mxu1 %v2237_v24 }
 0x12e   : > { %2114 = vmatprep.subr.bf16.mxu1 %v2239_v25 }
 0x12f   : > { %2093 = vmatpush3.bf16.msra.mxu0 %v2240_v26 }
 0x130   : > { %2094 = vmatprep.subr.bf16.mxu0 %v2242_v27 }
 0x131   : > { %2115 = vmatpush3.bf16.msra.mxu1 %v2241_v28 }
 0x132   : > { %2116 = vmatprep.subr.bf16.mxu1 %v2243_v29 }
 0x133   : > { %2095 = vmatpush3.bf16.msra.mxu0 %v2244_v30 }
 0x134   : > { %2096 = vmatprep.subr.bf16.mxu0 %v2246_v31 }
 0x135   : > { %2117 = vmatpush3.bf16.msra.mxu1 %v2245_v32 }
 0x136   : > { %2118 = vmatprep.subr.bf16.mxu1 %v2247_v33 }
 0x137   : > { %2097 = vmatpush3.bf16.msra.mxu0 %v2248_v34 }
 0x138   : > { %2098 = vmatprep.subr.bf16.mxu0 %v2250_v35 }
 0x139   : > { %2119 = vmatpush3.bf16.msra.mxu1 %v2249_v36 }
 0x13a   : > { %2120 = vmatprep.subr.bf16.mxu1 %v2251_v37 }
 0x13b   : > { %2099 = vmatpush3.bf16.msra.mxu0 %v2252_v38 }
 0x13c   : > { %2100 = vmatprep.subr.bf16.mxu0 %v2254_v39 }
 0x13d   : > { %2121 = vmatpush3.bf16.msra.mxu1 %v2253_v40 }
 0x13e   : > { %2122 = vmatprep.subr.bf16.mxu1 %v2255_v41 }
 0x13f   : > { %2101 = vmatpush3.bf16.msra.mxu0 %v2256_v47 }
 0x140   : > { %2102 = vmatprep.subr.bf16.mxu0 %v2258_v48 }
 0x141   : > { %2123 = vmatpush3.bf16.msra.mxu1 %v2257_v51 }
 0x142   : > { %2124 = vmatprep.subr.bf16.mxu1 %v2259_v53 }
 0x143   : > { %2103 = vmatpush3.bf16.msra.mxu0 %v2260_v55 }
 0x145   : > { %2125 = vmatpush3.bf16.msra.mxu1 %v2261_v58 }
 0x146   : > { %1635 = vmatmul.mubr.bf16.vlgmr.msra.gmra.mrb[12].mxu0 %v1396_v63 }
 0x148   : > { %1676 = vmatmul.mubr.bf16.vlgmr.msra.gmra.mrb[12].mxu1 %v1402_v42 }
 0x1d9   : > { %v2016_v1 = vpop.f32.mrb[4].mxu0 }
 0x1da   : > { %v2017_v2 = vpop.f32.mrb[5].mxu0 }
 0x1db   : > { %v2038_v3 = vpop.f32.mrb[4].mxu1  ;;  %v2018_v4 = vadd.f32 %v2017_v2, %v2016_v1  ;;  %v2019_v5 = vpop.f32.mrb[6].mxu0 }
 0x1dc   : > { %v2039_v6 = vpop.f32.mrb[5].mxu1  ;;  %v2020_v7 = vpop.f32.mrb[7].mxu0 }
 0x1dd   : > { %v2040_v43 = vadd.f32 %v2039_v6, %v2038_v3  ;;  %v2041_v8 = vpop.f32.mrb[6].mxu1  ;;  %v2021_v9 = vadd.f32 %v2020_v7, %v2019_v5 }
 0x1de   : > { %v2042_v10 = vpop.f32.mrb[7].mxu1 }
 0x1df   : > { %v1024_v11 = vadd.f32 %v2040_v43, %v2018_v4  ;;  %v2043_v12 = vadd.f32 %v2042_v10, %v2041_v8 }
 0x1e1   : > { %v1027_v44 = vadd.f32 %v2043_v12, %v2021_v9 }
 0x1f9   : > { %v2060_v13 = vpop.f32.mrb[8].mxu0 }
 0x1fa   : > { %v2061_v14 = vpop.f32.mrb[9].mxu0 }
 0x1fb   : > { %v2082_v15 = vpop.f32.mrb[8].mxu1  ;;  %v2062_v16 = vadd.f32 %v2061_v14, %v2060_v13  ;;  %v2063_v45 = vpop.f32.mrb[10].mxu0 }
 0x1fc   : > { %v2083_v17 = vpop.f32.mrb[9].mxu1  ;;  %v2064_v18 = vpop.f32.mrb[11].mxu0 }
 0x1fd   : > { %v1257_v19 = vadd.f32 %v2062_v16, %v1024_v11  ;;  %v2084_v20 = vadd.f32 %v2083_v17, %v2082_v15  ;;  %v2085_v21 = vpop.f32.mrb[10].mxu1  ;;  %v2065_v22 = vadd.f32 %v2064_v18, %v2063_v45 }
 0x1fe   : > { %v2086_v23 = vpop.f32.mrb[11].mxu1 }
 0x1ff   : > { %v1298_v24 = vadd.f32 %v2084_v20, %v1257_v19  ;;  %v1260_v25 = vadd.f32 %v2065_v22, %v1027_v44  ;;  %v2087_v26 = vadd.f32 %v2086_v23, %v2085_v21 }
 0x201   : > { %v1301_v27 = vadd.f32 %v2087_v26, %v1260_v25 }
 0x219   : > { %v2104_v28 = vpop.f32.mrb[12].mxu0 }
 0x21a   : > { %v2105_v29 = vpop.f32.mrb[13].mxu0 }
 0x21b   : > { %v2126_v30 = vpop.f32.mrb[12].mxu1  ;;  %v2106_v31 = vadd.f32 %v2105_v29, %v2104_v28  ;;  %v2107_v32 = vpop.f32.mrb[14].mxu0 }
 0x21c   : > { %v2127_v33 = vpop.f32.mrb[13].mxu1  ;;  %v2108_v34 = vpop.f32.mrb[15].mxu0 }
 0x21d   : > { %v2128_v35 = vadd.f32 %v2127_v33, %v2126_v30  ;;  %v2129_v36 = vpop.f32.mrb[14].mxu1  ;;  %v2109_v37 = vadd.f32 %v2108_v34, %v2107_v32 }
 0x21e   : > { %v2130_v38 = vpop.f32.mrb[15].mxu1 }
 0x21f   : > { %v1678_v39 = vadd.f32 %v2128_v35, %v2106_v31  ;;  %v2131_v40 = vadd.f32 %v2130_v38, %v2129_v36 }
 0x221   : > { %v1684_v41 = vadd.f32 %v1678_v39, %v1298_v24  ;;  %v1681_v46 = vadd.f32 %v2131_v40, %v2109_v37 }
 0x223   : > { %1686 = vst [vmem:[%s251_s27] sm:$0xff] %v1684_v41  ;;  %v1685_v47 = vadd.f32 %v1681_v46, %v1301_v27 }
 0x225   : > { %1687 = vst [vmem:[%s251_s27 + $0x8] sm:$0xff] %v1685_v47 }
 0x226 PF: > { %s16_s21 = sadd.s32 1, %s2268_s21  }
 0x227   : > { %p13_p4 = scmp.ge.s32.totalorder %s16_s21, 4  }
 0x229   :  { %15 = sbr.rel (!%p13_p4) target bundleno = 1 (0x1), region = 77 }

</bundles_post_ra>
